<compile_context>
chip_gen: v5e
topology: v5e:2x2
jax: 0.10.0
libtpu: 0.0.40
codegen_flags: <defaults>
</compile_context>

<pallas_src>
import math

import jax
import jax.numpy as jnp
from jax.experimental import pallas as pl
from jax.experimental.pallas import tpu as pltpu


def _cdiv(a, b):
    return -(-a // b)


def _round_up(x, m):
    return ((x + m - 1) // m) * m


def _choose_pack(seq_len: int, dim: int, w_cap: int = 1024) -> int:
    """Positions packed per output row so the packed row width p*dim is a multiple of 128."""
    if dim % 128 == 0 or dim > w_cap:
        return 1  # already lane-dense (or too wide to pack)
    p0 = 128 // math.gcd(dim, 128)  # smallest p with (p*dim) % 128 == 0
    best = 1                        # fallback: masked stores (still correct, just slower)
    p = p0
    while p * dim <= w_cap:
        if seq_len % p == 0:
            best = p
        p += p0
    return best


def _rope_kernel(scaled_ref, qrow_ref, o_ref):
    # scaled_ref: (1, W) = p * inv_freq_tiled                 (resident, constant index_map)
    # qrow_ref:   (1, W) = (lane // dim) * inv_freq_tiled     (resident, constant index_map)
    # o_ref:      (tm, W) output tile; packed row r covers positions r*p .. r*p + p - 1
    tm = o_ref.shape[0]
    start = (pl.program_id(0) * tm).astype(jnp.float32)       # first packed row of this tile
    offset = qrow_ref[...] + start * scaled_ref[...]          # (1, W) per-step row (negligible)
    rows = jax.lax.broadcasted_iota(jnp.int32, o_ref.shape, 0).astype(jnp.float32)
    o_ref[...] = rows * scaled_ref[...] + offset              # pos * inv_freq, lane-dense store


def rotary_embedding(max_seq_len: int, dim: int, *, base: float = 10000.0) -> jax.Array:
    """RoPE frequency table of shape (max_seq_len, dim), float32 (matches the torch module)."""
    assert dim % 2 == 0, "head dim must be even for RoPE"

    # Buffer precompute (mirrors register_buffer in __init__); duplicated halves so the
    # kernel reproduces cat((freqs, freqs), -1) with plain dense stores.
    inv_freq = 1.0 / (base ** (jnp.arange(0, dim, 2, dtype=jnp.float32) / dim))  # (dim/2,)
    inv_full = jnp.concatenate([inv_freq, inv_freq])                             # (dim,)

    # Lane packing: W = p*dim lanes per packed row, R = seq/p packed rows.
    p = _choose_pack(max_seq_len, dim)
    W = p * dim
    R = max_seq_len // p
    assert R * p == max_seq_len

    inv_tiled = jnp.tile(inv_full, p)                                            # (W,)
    scaled = (float(p) * inv_tiled)[None, :]                                     # (1, W)
    qrow = ((jnp.arange(W) // dim).astype(jnp.float32) * inv_tiled)[None, :]     # (1, W)

    # Row tile: aim for 2 grid steps (one per v7x core); grow the (even) step count only
    # if a single tile would exceed ~4 MiB (<= 8 MiB double-buffered on every generation).
    cap_rows = max(8, ((4 * 1024 * 1024) // (W * 4)) // 8 * 8)
    if R <= 8:
        tm, grid = R, 1
    else:
        tm = min(cap_rows, _round_up(_cdiv(R, 2), 8))
        grid = _cdiv(R, tm)
        if grid > 2 and grid % 2 == 1:  # VMEM-capped into an odd step count -> make it even
            tm = min(cap_rows, _round_up(_cdiv(R, grid + 1), 8))
            grid = _cdiv(R, tm)

    out_packed = pl.pallas_call(
        _rope_kernel,
        out_shape=jax.ShapeDtypeStruct((R, W), jnp.float32),
        grid_spec=pltpu.PrefetchScalarGridSpec(
            num_scalar_prefetch=0,
            grid=(grid,),
            in_specs=[pl.BlockSpec((1, W), lambda i: (0, 0)),    # resident constants
                      pl.BlockSpec((1, W), lambda i: (0, 0))],
            out_specs=pl.BlockSpec((tm, W), lambda i: (i, 0)),   # lane-dense row tiles
        ),
        compiler_params=pltpu.CompilerParams(
            dimension_semantics=("parallel",),   # v7x: shard row tiles across both TCs
        ),
        cost_estimate=pl.CostEstimate(
            flops=2 * max_seq_len * dim,
            transcendentals=0,
            bytes_accessed=max_seq_len * dim * 4 + 2 * W * 4,
        ),
    )(scaled, qrow)

    # Packed element (r, l) holds position r*p + l//dim, freq index l%dim, i.e. exactly the
    # row-major flat index pos*dim + j of the (seq, dim) table: reshape is metadata-only.
    return out_packed.reshape(max_seq_len, dim)


def rotary_embedding_ref(max_seq_len: int, dim: int, base: float = 10000.0) -> jax.Array:
    inv_freq = 1.0 / (base ** (jnp.arange(0, dim, 2, dtype=jnp.float32) / dim))
    seq = jnp.arange(max_seq_len, dtype=jnp.float32)
    freqs = jnp.einsum("i,j->ij", seq, inv_freq)
    return jnp.concatenate([freqs, freqs], axis=-1)


if __name__ == "__main__":
    # Module forward takes only max_seq_len; config supplies d_model / n_heads.
    _ = jax.random.PRNGKey(0)  # forward is position-only; no tensor inputs needed
    config = {"d_model": 128, "n_heads": 4}
    dim = config["d_model"] // config["n_heads"]   # head dim = 32
    max_seq_len = 8

    out = jax.block_until_ready(rotary_embedding(max_seq_len, dim))
    ref = rotary_embedding_ref(max_seq_len, dim)

    assert out.shape == (max_seq_len, dim), out.shape
    assert out.dtype == jnp.float32, out.dtype
    assert jnp.allclose(out, ref, atol=1e-5, rtol=1e-5), "mismatch vs reference"

    print("KERNEL_OK")
</pallas_src>

<mosaic_0001>
module attributes {stable_mosaic.version = 11 : i64} {
  func.func @_rope_kernel(%arg0: i32, %arg1: memref<1x256xf32, #tpu.memory_space<vmem>>, %arg2: memref<1x256xf32, #tpu.memory_space<vmem>>, %arg3: memref<1x256xf32, #tpu.memory_space<vmem>>) attributes {dimension_semantics = [#tpu.dimension_semantics<parallel>], iteration_bounds = array<i64: 1>, scalar_prefetch = 0 : i64, scratch_operands = 0 : i64, tpu.core_type = #tpu.core_type<tc>, window_params = [{pipeline_mode = #tpu.pipeline_mode<synchronous>, transform_indices = @transform_0, window_bounds = array<i64: 1, 256>}, {pipeline_mode = #tpu.pipeline_mode<synchronous>, transform_indices = @transform_1, window_bounds = array<i64: 1, 256>}, {transform_indices = @transform_2, window_bounds = array<i64: 1, 256>}]} {
    %c1_i32 = arith.constant 1 : i32
    %0 = arith.muli %arg0, %c1_i32 : i32
    %1 = arith.sitofp %0 : i32 to f32
    %c0 = arith.constant 0 : index
    %c0_0 = arith.constant 0 : index
    %2 = vector.load %arg2[%c0, %c0_0] : memref<1x256xf32, #tpu.memory_space<vmem>>, vector<1x256xf32>
    %c0_1 = arith.constant 0 : index
    %c0_2 = arith.constant 0 : index
    %3 = vector.load %arg1[%c0_1, %c0_2] : memref<1x256xf32, #tpu.memory_space<vmem>>, vector<1x256xf32>
    %4 = vector.broadcast %1 : f32 to vector<1x256xf32>
    %5 = arith.mulf %4, %3 : vector<1x256xf32>
    %6 = arith.addf %2, %5 : vector<1x256xf32>
    %7 = tpu.iota {dimensions = array<i32: 0>} : vector<1x256xi32>
    %8 = arith.sitofp %7 : vector<1x256xi32> to vector<1x256xf32>
    %c0_3 = arith.constant 0 : index
    %c0_4 = arith.constant 0 : index
    %9 = vector.load %arg1[%c0_3, %c0_4] : memref<1x256xf32, #tpu.memory_space<vmem>>, vector<1x256xf32>
    %10 = arith.mulf %8, %9 : vector<1x256xf32>
    %11 = arith.addf %10, %6 : vector<1x256xf32>
    %c0_5 = arith.constant 0 : index
    %c0_6 = arith.constant 0 : index
    %12 = vector.load %arg3[%c0_5, %c0_6] : memref<1x256xf32, #tpu.memory_space<vmem>>, vector<1x256xf32>
    tpu.vector_store %arg3[%c0_5, %c0_6], %11 {strides = array<i32>} : memref<1x256xf32, #tpu.memory_space<vmem>>, vector<1x256xf32>,
    return
  }
  func.func @transform_0(%arg0: i32) -> (i32, i32) {
    %c0_i32 = arith.constant 0 : i32
    %c0_i32_0 = arith.constant 0 : i32
    %c0_i32_1 = arith.constant 0 : i32
    return %c0_i32, %c0_i32_0 : i32, i32
  }
  func.func @transform_1(%arg0: i32) -> (i32, i32) {
    %c0_i32 = arith.constant 0 : i32
    %c0_i32_0 = arith.constant 0 : i32
    %c0_i32_1 = arith.constant 0 : i32
    return %c0_i32, %c0_i32_0 : i32, i32
  }
  func.func @transform_2(%arg0: i32) -> (i32, i32) {
    %c0_i32 = arith.constant 0 : i32
    %c0_i32_0 = arith.constant 0 : i32
    return %arg0, %c0_i32 : i32, i32
  }
}

</mosaic_0001>

<bundles_post_ra>
// kernel: tpu_custom_call.1
= control target key start
LH: loop header
LB: loop body
LE: loop exit
PB: predicated region body
PF: predicated region fallthrough
CT: control target
= control target key end

     0   :  { %7 = vsyncpa [#allocation3], 0  ;;  %s200_s0 = inlined_call_operand.hbm [shape: f32[1,256], index: 0, kind: input, shape index: {}]   ;;  %s201_s1 = inlined_call_operand.hbm [shape: f32[1,256], index: 1, kind: input, shape index: {}]   ;;  %s202_s2 = inlined_call_operand.hbm [shape: f32[1,256], index: 2, kind: output, shape index: {}]  }
   0x1   :  { %8 = vsyncpa [#allocation6], 0 }
   0x2   :  { %9 = vsyncpa [#allocation4], 0  ;;  %s15_s11 = sshll.u32 %s200_s0, 4  ;;  %s173_s12 = smov [#allocation2]   ;;  %s16_s11 = int_to_ptr.hbm [resolvable:$true] %s15_s11 }
   0x3   :  { %s17_s13 = sshll.u32 %s173_s12, 4  ;;  %s26_s16 = sshll.u32 %s201_s1, 4  ;;  %s18_s13 = int_to_ptr.vmem [resolvable:$true] %s17_s13  ;;  %s27_s16 = int_to_ptr.hbm [resolvable:$true] %s26_s16 }
   0x4   :  { %20 = dma.hbm_to_vmem [thread:$0]  %s16_s11, 32, %s18_s13, [#allocation3]  }
   0x5   :  { %s174_s17 = smov [#allocation5]  }
   0x6   :  { %s28_s18 = sshll.u32 %s174_s17, 4  ;;  %s29_s18 = int_to_ptr.vmem [resolvable:$true] %s28_s18 }
   0x7   :  { %31 = dma.hbm_to_vmem [thread:$0]  %s27_s16, 32, %s29_s18, [#allocation6]  }
   0x8   :  { %167 = dma.done.wait [#allocation3], 32  }
   0x9   :  { %168 = vsyncadd [#allocation3], 4294967264 }
   0xa   :  { %169 = dma.done.wait [#allocation6], 32  }
   0xb   :  { %170 = vsyncadd [#allocation6], 4294967264  ;;  %v46_v0 = vlaneseq  ;;  %v41_v3 = vld [vmem:[#allocation5] sm:$0x3]  ;;  %v42_v4 = vld [vmem:[#allocation2] sm:$0x3] }
   0xc   :  { %v44_v5 = vmul.f32 0.0, %v42_v4  ;;  %v50_v6 = vperm.slane %v42_v4, 0  ;;  %v51_v7 = vperm.slane %v42_v4, 1  ;;  %s175_s0 = smov [#allocation7]   ;;  %s81_s21 = sshll.u32 %s202_s2, 4  ;;  %vm66_vm0 = vcmask 1040384   ;;  %s82_s21 = int_to_ptr.hbm [resolvable:$true] %s81_s21 }
   0xd   :  { %v47_v1 = vshrl.u32 %v46_v0, 7  ;;  %s79_s1 = sshll.u32 %s175_s0, 4  ;;  %vm71_vm1 = vcmp.lt.s32.totalorder %v46_v0, 256  ;;  %s80_s1 = int_to_ptr.vmem [resolvable:$true] %s79_s1 }
   0xe   :  { %v45_v8 = vadd.f32 %v44_v5, %v41_v3 }
   0xf   :  { %v48_v2 = vcvt.s32.f32 %v47_v1 }
  0x10   :  { %v57_v11 = vperm.slane %v45_v8, 0  ;;  %v58_v12 = vperm.slane %v45_v8, 1 }
  0x11   :  { %v54_v9 = vmul.f32 %v50_v6, %v48_v2  ;;  %v55_v10 = vmul.f32 %v51_v7, %v48_v2 }
  0x13   :  { %v61_v13 = vadd.f32 %v57_v11, %v54_v9  ;;  %v62_v14 = vadd.f32 %v58_v12, %v55_v10 }
  0x15   :  { %v65_v15 = vrot.slane %v62_v14, 7 }
  0x17   :  { %v67_v16 = vsel %vm66_vm0, %v61_v13, %v65_v15 }
  0x18   :  { %73 = vst.msk [vmem:[#allocation7] sm:$0x3] %vm71_vm1, %v67_v16 }
  0x19   :  { %84 = dma.vmem_to_hbm [thread:$0]  %s80_s1, 32, %s82_s21, [#allocation4]  }
  0x1a   :  { %171 = dma.done.wait [#allocation4], 32  }
  0x1b   :  { %172 = vsyncadd [#allocation4], 4294967264 }
  0x1c   :  { %89 = vsyncpa [#allocation3], 1 }
  0x1d   :  { %90 = vsyncpa [#allocation6], 1 }
  0x1e   :  { %91 = vsyncpa [#allocation4], 1 }

</bundles_post_ra>
